<compile_context>
chip_gen: v5e
topology: v5e:2x2
jax: 0.10.0
libtpu: 0.0.40
codegen_flags: <defaults>
</compile_context>

<pallas_src>
import functools
import math

import jax
import jax.numpy as jnp
from jax.experimental import pallas as pl
from jax.experimental.pallas import tpu as pltpu


def bert_embedding_kernel(seed_ref, seq_ref, pos_ref, lab_ref, tbl_ref, *rest,
                          dropout_p, training, num_segments, use_hw_prng):
    """One grid step handles TB whole sequences.

    seed_ref : (1,)        int32  SMEM (scalar prefetch; used only by HW-PRNG dropout)
    seq_ref  : (TB, S, E)  VMEM   pre-embedded token sequence
    pos_ref  : (S, E)      VMEM   sinusoidal positional table (resident across the grid)
    lab_ref  : (TB, S, 1)  int32  VMEM   segment labels
    tbl_ref  : (V, E)      VMEM   segment-embedding table (resident across the grid)
    rest     : ([bits_ref (TB, S, E) uint32,] out_ref (TB, S, E))
    """
    apply_dropout = training and dropout_p > 0.0
    if apply_dropout and not use_hw_prng and dropout_p < 1.0:
        bits_ref, out_ref = rest
    else:
        out_ref = rest[-1]
        bits_ref = None

    # Accumulate in f32 regardless of in/out dtype; cast once at the store.
    seq = seq_ref[...].astype(jnp.float32)            # (TB, S, E)
    lab = lab_ref[...]                                 # (TB, S, 1) int32

    # Segment-embedding lookup: tiny vocab (V rows) -> V-1 nested selects.
    # The final "else" branch is row 0, so this is exact even if the padding row of
    # the table is ever non-zero.  Out-of-range labels map to row 0 (documented).
    seg = jnp.broadcast_to(tbl_ref[0, :].astype(jnp.float32), seq.shape)
    for k in range(1, num_segments):
        seg = jnp.where(lab == k, tbl_ref[k, :].astype(jnp.float32), seg)

    # pos (S, E) broadcasts over the leading TB axis.
    x = seq + pos_ref[...].astype(jnp.float32) + seg

    if apply_dropout:
        if dropout_p >= 1.0:
            # PyTorch Dropout(p=1) zeroes everything; avoid 1/(1-p) = inf.
            x = jnp.zeros_like(x)
        else:
            # Inverted dropout: keep with prob (1-p), scale kept by 1/(1-p).
            # Integer-threshold compare + a single fused select.
            thresh = jnp.uint32(min(int(round(dropout_p * (2.0 ** 32))), 0xFFFFFFFF))
            if use_hw_prng:
                # Seed with (base seed, tile index) as separate words to avoid
                # correlated consecutive-integer seeds.
                pltpu.prng_seed(seed_ref[0], pl.program_id(0))
                bits = pltpu.bitcast(pltpu.prng_random_bits(x.shape), jnp.uint32)
            else:
                bits = bits_ref[...]
            keep = bits >= thresh
            x = jnp.where(keep, x * (1.0 / (1.0 - dropout_p)), 0.0)

    out_ref[...] = x.astype(out_ref.dtype)


def bert_embedding(sequence, segment_label, pos_emb, seg_table, seed,
                   *, dropout_p=0.1, training=True, out_dtype=None):
    """Fused  sequence + positional + segment-embedding lookup + dropout."""
    B, S, E = sequence.shape
    V = seg_table.shape[0]
    out_dtype = jnp.dtype(out_dtype) if out_dtype is not None else jnp.dtype(sequence.dtype)

    lab = segment_label.astype(jnp.int32).reshape(B, S, 1)

    apply_dropout = bool(training) and float(dropout_p) > 0.0
    use_hw_prng = apply_dropout and (jax.default_backend() == "tpu")
    need_bits_stream = apply_dropout and (not use_hw_prng) and float(dropout_p) < 1.0

    # ---- generation-aware VMEM budgeting ---------------------------------------
    try:
        vmem_cap = int(pltpu.get_tpu_info().vmem_capacity_bytes)
    except Exception:
        vmem_cap = 64 << 20                    # conservative (v7x-sized) fallback
    budget = (vmem_cap * 2) // 5               # ~25 MiB on 64 MiB parts, ~51 MiB on 128 MiB

    seq_bytes = S * E * jnp.dtype(sequence.dtype).itemsize
    out_bytes = S * E * out_dtype.itemsize
    bits_bytes = S * E * 4 if need_bits_stream else 0
    lab_bytes = S * 128 * 4                    # lane-padded (., S, 1) int32 VMEM footprint
    per_seq_vmem = 2 * (seq_bytes + out_bytes + bits_bytes + lab_bytes)   # double-buffered
    resident_bytes = 2 * (S * E * jnp.dtype(pos_emb.dtype).itemsize
                          + V * E * jnp.dtype(seg_table.dtype).itemsize)

    # ---- tile: TB whole sequences per grid step --------------------------------
    tb = (budget - resident_bytes) // max(1, per_seq_vmem)
    tb = max(1, min(int(tb), B))
    if B >= 2:
        tb = min(tb, pl.cdiv(B, 2))            # keep grid >= 2 so both v7x TCs get work
    while B % tb:                              # keep the grid exact
        tb -= 1
    TB = int(tb)
    grid = (B // TB,)

    vmem_est = per_seq_vmem * TB + resident_bytes
    vmem_limit = max(32 << 20, vmem_est * 5 // 4)
    vmem_limit = int(min(vmem_limit, vmem_cap * 7 // 8))   # <=56 MiB on v7x, ample elsewhere

    kernel = functools.partial(
        bert_embedding_kernel,
        dropout_p=float(dropout_p),
        training=bool(training),
        num_segments=int(V),
        use_hw_prng=bool(use_hw_prng),
    )

    in_specs = [
        pl.BlockSpec((TB, S, E), lambda b, seed_ref: (b, 0, 0)),   # sequence
        pl.BlockSpec((S, E), lambda b, seed_ref: (0, 0)),          # positional table (resident)
        pl.BlockSpec((TB, S, 1), lambda b, seed_ref: (b, 0, 0)),   # segment labels
        pl.BlockSpec((V, E), lambda b, seed_ref: (0, 0)),          # segment table (resident)
    ]
    operands = [sequence, pos_emb, lab, seg_table]

    if need_bits_stream:
        # Portable dropout path (non-TPU backend / interpret): pre-generated uint32 bits.
        bits = jax.random.bits(jax.random.PRNGKey(int(seed)), (B, S, E), dtype=jnp.uint32)
        in_specs.append(pl.BlockSpec((TB, S, E), lambda b, seed_ref: (b, 0, 0)))
        operands.append(bits)

    out = pl.pallas_call(
        kernel,
        out_shape=jax.ShapeDtypeStruct((B, S, E), out_dtype),
        grid_spec=pltpu.PrefetchScalarGridSpec(
            num_scalar_prefetch=1,             # seed lands in SMEM
            grid=grid,
            in_specs=in_specs,
            out_specs=pl.BlockSpec((TB, S, E), lambda b, seed_ref: (b, 0, 0)),
        ),
        compiler_params=pltpu.CompilerParams(
            dimension_semantics=("parallel",),  # grid steps are independent batch tiles
            vmem_limit_bytes=vmem_limit,
        ),
    )(jnp.asarray([seed], jnp.int32), *operands)

    return out


# ---------------------------------------------------------------------------
# Parameter / constant construction (plain-JAX glue, deterministic init)
# ---------------------------------------------------------------------------
def make_sinusoidal_pe(seq_len, d_model):
    """Standard BERT PositionalEmbedding buffer: pe[:, 0::2]=sin, pe[:, 1::2]=cos."""
    pos = jnp.arange(seq_len, dtype=jnp.float32)[:, None]
    div = jnp.exp(jnp.arange(0, d_model, 2, dtype=jnp.float32)
                  * (-math.log(10000.0) / d_model))
    pe = jnp.zeros((seq_len, d_model), jnp.float32)
    pe = pe.at[:, 0::2].set(jnp.sin(pos * div))
    pe = pe.at[:, 1::2].set(jnp.cos(pos * div))
    return pe


def make_segment_table(key, num_segments, embed_size):
    """nn.Embedding(3, embed_size, padding_idx=0): N(0,1) init, row 0 zeroed."""
    tbl = jax.random.normal(key, (num_segments, embed_size), jnp.float32)
    return tbl.at[0].set(0.0)


if __name__ == "__main__":
    # Small, module-consistent shapes.
    mini_batch_size = 2      # B
    sample_num      = 8      # S (sequence positions)
    embed_size      = 32     # E
    dropout_p       = 0.1
    num_segments    = 3      # segment vocab: {pad:0, sent_A:1, sent_B:2}

    key = jax.random.PRNGKey(0)
    k_seq, k_tbl, k_lab = jax.random.split(key, 3)

    sequence = jax.random.normal(
        k_seq, (mini_batch_size, sample_num, embed_size), jnp.float32)
    segment_label = jax.random.randint(
        k_lab, (mini_batch_size, sample_num), 0, num_segments, jnp.int32)

    pos_emb = make_sinusoidal_pe(sample_num, embed_size)
    seg_table = make_segment_table(k_tbl, num_segments, embed_size)

    ref = sequence + pos_emb[None, :, :] + seg_table[segment_label]

    # --- eval mode (dropout disabled): must match pure-JAX reference ---
    out_eval = jax.block_until_ready(
        bert_embedding(sequence, segment_label, pos_emb, seg_table,
                       seed=0, dropout_p=dropout_p, training=False))
    assert out_eval.shape == sequence.shape
    assert jnp.allclose(out_eval, ref, atol=1e-5, rtol=1e-5), "mismatch vs reference"

    # --- training mode: every element is either dropped (0) or ref/(1-p) ---
    out_train = jax.block_until_ready(
        bert_embedding(sequence, segment_label, pos_emb, seg_table,
                       seed=1234, dropout_p=dropout_p, training=True))
    assert out_train.shape == sequence.shape
    scaled = ref * (1.0 / (1.0 - dropout_p))
    kept = jnp.abs(out_train - scaled) <= (1e-4 + 1e-4 * jnp.abs(scaled))
    dropped = out_train == 0.0
    assert bool(jnp.all(kept | dropped)), "dropout output not {0, x/(1-p)}"

    # --- optional bf16 output path (halves store traffic), eval mode smoke test ---
    out_bf16 = jax.block_until_ready(
        bert_embedding(sequence, segment_label, pos_emb, seg_table,
                       seed=0, dropout_p=dropout_p, training=False,
                       out_dtype=jnp.bfloat16))
    assert out_bf16.dtype == jnp.bfloat16
    assert jnp.allclose(out_bf16.astype(jnp.float32), ref, atol=5e-2, rtol=5e-2)

    print("KERNEL_OK")
</pallas_src>

<mosaic_0001>
module attributes {stable_mosaic.version = 11 : i64} {
  func.func @bert_embedding_kernel(%arg0: i32, %arg1: memref<1xi32, #tpu.memory_space<smem>>, %arg2: memref<1x8x32xf32, #tpu.memory_space<vmem>>, %arg3: memref<8x32xf32, #tpu.memory_space<vmem>>, %arg4: memref<1x8x1xi32, #tpu.memory_space<vmem>>, %arg5: memref<3x32xf32, #tpu.memory_space<vmem>>, %arg6: memref<1x8x32xf32, #tpu.memory_space<vmem>>) attributes {dimension_semantics = [#tpu.dimension_semantics<parallel>], iteration_bounds = array<i64: 2>, scalar_prefetch = 1 : i64, scratch_operands = 0 : i64, tpu.core_type = #tpu.core_type<tc>, window_params = [{transform_indices = @transform_0, window_bounds = array<i64: 1, 8, 32>}, {pipeline_mode = #tpu.pipeline_mode<synchronous>, transform_indices = @transform_1, window_bounds = array<i64: 8, 32>}, {transform_indices = @transform_2, window_bounds = array<i64: 1, 8, 1>}, {pipeline_mode = #tpu.pipeline_mode<synchronous>, transform_indices = @transform_3, window_bounds = array<i64: 3, 32>}, {transform_indices = @transform_4, window_bounds = array<i64: 1, 8, 32>}]} {
    %c0 = arith.constant 0 : index
    %c0_0 = arith.constant 0 : index
    %c0_1 = arith.constant 0 : index
    %0 = vector.load %arg2[%c0, %c0_0, %c0_1] : memref<1x8x32xf32, #tpu.memory_space<vmem>>, vector<1x8x32xf32>
    %c0_2 = arith.constant 0 : index
    %c0_3 = arith.constant 0 : index
    %c0_4 = arith.constant 0 : index
    %1 = vector.load %arg4[%c0_2, %c0_3, %c0_4] : memref<1x8x1xi32, #tpu.memory_space<vmem>>, vector<1x8x1xi32>
    %c0_5 = arith.constant 0 : index
    %c0_6 = arith.constant 0 : index
    %2 = vector.load %arg5[%c0_5, %c0_6] : memref<3x32xf32, #tpu.memory_space<vmem>>, vector<1x32xf32>
    %3 = vector.shape_cast %2 : vector<1x32xf32> to vector<32xf32>
    %4 = vector.shape_cast %3 : vector<32xf32> to vector<1x1x32xf32>
    %5 = vector.broadcast %4 : vector<1x1x32xf32> to vector<1x8x32xf32>
    %c1_i32 = arith.constant 1 : i32
    %6 = vector.broadcast %c1_i32 : i32 to vector<1x8x1xi32>
    %7 = arith.cmpi eq, %1, %6 : vector<1x8x1xi32>
    %c1 = arith.constant 1 : index
    %c0_7 = arith.constant 0 : index
    %8 = vector.load %arg5[%c1, %c0_7] : memref<3x32xf32, #tpu.memory_space<vmem>>, vector<1x32xf32>
    %9 = vector.shape_cast %8 : vector<1x32xf32> to vector<32xf32>
    %10 = vector.shape_cast %7 : vector<1x8x1xi1> to vector<1x8x1xi1>
    %11 = vector.broadcast %10 : vector<1x8x1xi1> to vector<1x8x32xi1>
    %12 = vector.shape_cast %9 : vector<32xf32> to vector<1x1x32xf32>
    %13 = vector.broadcast %12 : vector<1x1x32xf32> to vector<1x8x32xf32>
    %14 = arith.select %11, %13, %5 : vector<1x8x32xi1>, vector<1x8x32xf32>
    %c2_i32 = arith.constant 2 : i32
    %15 = vector.broadcast %c2_i32 : i32 to vector<1x8x1xi32>
    %16 = arith.cmpi eq, %1, %15 : vector<1x8x1xi32>
    %c2 = arith.constant 2 : index
    %c0_8 = arith.constant 0 : index
    %17 = vector.load %arg5[%c2, %c0_8] : memref<3x32xf32, #tpu.memory_space<vmem>>, vector<1x32xf32>
    %18 = vector.shape_cast %17 : vector<1x32xf32> to vector<32xf32>
    %19 = vector.shape_cast %16 : vector<1x8x1xi1> to vector<1x8x1xi1>
    %20 = vector.broadcast %19 : vector<1x8x1xi1> to vector<1x8x32xi1>
    %21 = vector.shape_cast %18 : vector<32xf32> to vector<1x1x32xf32>
    %22 = vector.broadcast %21 : vector<1x1x32xf32> to vector<1x8x32xf32>
    %23 = arith.select %20, %22, %14 : vector<1x8x32xi1>, vector<1x8x32xf32>
    %c0_9 = arith.constant 0 : index
    %c0_10 = arith.constant 0 : index
    %24 = vector.load %arg3[%c0_9, %c0_10] : memref<8x32xf32, #tpu.memory_space<vmem>>, vector<8x32xf32>
    %25 = vector.shape_cast %24 : vector<8x32xf32> to vector<1x8x32xf32>
    %26 = arith.addf %0, %25 : vector<1x8x32xf32>
    %27 = arith.addf %26, %23 : vector<1x8x32xf32>
    %c0_11 = arith.constant 0 : index
    %c0_12 = arith.constant 0 : index
    %c0_13 = arith.constant 0 : index
    %28 = vector.load %arg6[%c0_11, %c0_12, %c0_13] : memref<1x8x32xf32, #tpu.memory_space<vmem>>, vector<1x8x32xf32>
    tpu.vector_store %arg6[%c0_11, %c0_12, %c0_13], %27 {strides = array<i32>} : memref<1x8x32xf32, #tpu.memory_space<vmem>>, vector<1x8x32xf32>,
    return
  }
  func.func @transform_0(%arg0: i32, %arg1: memref<1xi32, #tpu.memory_space<smem>>) -> (i32, i32, i32) {
    %c0_i32 = arith.constant 0 : i32
    %c0_i32_0 = arith.constant 0 : i32
    %c0_i32_1 = arith.constant 0 : i32
    return %arg0, %c0_i32, %c0_i32_0 : i32, i32, i32
  }
  func.func @transform_1(%arg0: i32, %arg1: memref<1xi32, #tpu.memory_space<smem>>) -> (i32, i32) {
    %c0_i32 = arith.constant 0 : i32
    %c0_i32_0 = arith.constant 0 : i32
    %c0_i32_1 = arith.constant 0 : i32
    return %c0_i32, %c0_i32_0 : i32, i32
  }
  func.func @transform_2(%arg0: i32, %arg1: memref<1xi32, #tpu.memory_space<smem>>) -> (i32, i32, i32) {
    %c0_i32 = arith.constant 0 : i32
    %c0_i32_0 = arith.constant 0 : i32
    %c0_i32_1 = arith.constant 0 : i32
    return %arg0, %c0_i32, %c0_i32_0 : i32, i32, i32
  }
  func.func @transform_3(%arg0: i32, %arg1: memref<1xi32, #tpu.memory_space<smem>>) -> (i32, i32) {
    %c0_i32 = arith.constant 0 : i32
    %c0_i32_0 = arith.constant 0 : i32
    %c0_i32_1 = arith.constant 0 : i32
    return %c0_i32, %c0_i32_0 : i32, i32
  }
  func.func @transform_4(%arg0: i32, %arg1: memref<1xi32, #tpu.memory_space<smem>>) -> (i32, i32, i32) {
    %c0_i32 = arith.constant 0 : i32
    %c0_i32_0 = arith.constant 0 : i32
    %c0_i32_1 = arith.constant 0 : i32
    return %arg0, %c0_i32, %c0_i32_0 : i32, i32, i32
  }
}

</mosaic_0001>

<bundles_post_ra>
// kernel: tpu_custom_call.1
= control target key start
LH: loop header
LB: loop body
LE: loop exit
PB: predicated region body
PF: predicated region fallthrough
CT: control target
= control target key end

     0   :  { %11 = vsyncpa [#allocation5], 0  ;;  %s736_s0 = inlined_call_operand.<no memory space> [shape: s32[1], index: 0, kind: input, shape index: {}]   ;;  %s737_s1 = inlined_call_operand.vmem [shape: f32[2,8,32], index: 1, kind: input, shape index: {}]   ;;  %s738_s2 = inlined_call_operand.hbm [shape: f32[8,32], index: 2, kind: input, shape index: {}]   ;;  %s739_s3 = inlined_call_operand.vmem [shape: s32[2,8,1], index: 3, kind: input, shape index: {}]   ;;  %s740_s4 = inlined_call_operand.hbm [shape: f32[3,32], index: 4, kind: input, shape index: {}]   ;;  %s741_s5 = inlined_call_operand.hbm [shape: f32[2,8,32], index: 5, kind: output, shape index: {}]  }
   0x1   :  { %12 = vsyncpa [#allocation8], 0 }
   0x2   :  { %13 = vsyncpa [#allocation6], 0 }
   0x3   :  { %15 = vsyncpa [#allocation6 + $0x1], 0  ;;  %s623_s0 = smov 0   ;;  %s625_s18 = smov 0  }
   0x4   :  { %s627_s19 = smov 0   ;;  %s629_s20 = smov 0  }
   0x5 LB: > { %s644_s21 = sadd.s32 4294967295, %s588_s20   ;;  %s378_s22 = sadd.s32 4294967294, %s588_s20   ;;  %s588_s20 = sphi %s629_s20, %s748_s20   ;;  %s584_s19 = sphi %s627_s19, %s747_s19   ;;  %s580_s18 = sphi %s625_s18, %s746_s18   ;;  %s576_s0 = sphi %s623_s0, %s745_s0  }
   0x6   : > { %s648_s23 = sadd.s32 1, %s588_s20   ;;  %s122_s24 = sadd.s32 1, %s584_s19 }
   0x7   : > { %s119_s25 = ssub.s32 %s588_s20, %s648_s23  ;;  %p132_p0 = scmp.ne.s32.totalorder %s584_s19, %s580_s18 }
   0x8   : > { %p120_p1 = scmp.eq.s32.totalorder %s119_s25, 0  ;;  %p133_p2 = scmp.eq.s32.totalorder %s644_s21, 1 }
   0x9   : > { %p138_p3 = scmp.ne.s32.totalorder %s580_s18, %s576_s0  ;;  %p139_p4 = scmp.eq.s32.totalorder %s378_s22, 1 }
   0xa   : > { %s659_s26 = scalar_select %p120_p1, %s584_s19, %s122_s24  }
   0xb   : > { %p661_p5 = por %p133_p2, %p132_p0  ;;  %p665_p6 = por %p139_p4, %p138_p3 }
   0xc   : > { %p379_p7 = scmp.ge.s32.totalorder %s588_s20, 1  ;;  %p146_p8 = scmp.lt.s32.totalorder %s588_s20, 3 }
   0xd   : > { %p414_p9 = scmp.eq.s32.totalorder %s644_s21, 0  ;;  %s158_s7 = sshll.u32 %s738_s2, 4  ;;  %s159_s7 = int_to_ptr.hbm [resolvable:$true] %s158_s7 }
   0xe   : > { %p672_p10 = pnand %p379_p7, %p146_p8  ;;  %s590_s8 = smov [#allocation4]  }
   0xf   : > { %s160_s9 = sshll.u32 %s590_s8, 4  ;;  %s170_s12 = sshll.u32 %s740_s4, 4  ;;  %s161_s9 = int_to_ptr.vmem [resolvable:$true] %s160_s9  ;;  %s171_s12 = int_to_ptr.hbm [resolvable:$true] %s170_s12 }
  0x10   : > { %p403_p11 = pneg %p672_p10  ;;  %s591_s13 = smov [#allocation7]  }
  0x11   : > { %s172_s14 = sshll.u32 %s591_s13, 4  ;;  %199 = sbr.rel (%p672_p10) target bundleno = 164 (0xa4), region = 36  ;;  %s173_s14 = int_to_ptr.vmem [resolvable:$true] %s172_s14 }
  0x12   : > { %p404_p12 = pnand %p414_p9, %p403_p11 }
  0x14   : > { %406 = dma.hbm_to_vmem [thread:$0]  (!%p404_p12), %s159_s7, 128, %s161_s9, [#allocation5]  }
  0x15   : > { %409 = dma.hbm_to_vmem [thread:$0]  (!%p404_p12), %s171_s12, 64, %s173_s14, [#allocation8]  }
  0x16   : > { %563 = dma.done.wait (%p414_p9), [#allocation5], 128  }
  0x17   : > { %565 = vsyncadd (%p414_p9), [#allocation5], 4294967168 }
  0x18   : > { %567 = dma.done.wait (%p414_p9), [#allocation8], 64  }
  0x19   : > { %569 = vsyncadd (%p414_p9), [#allocation8], 4294967232  ;;  %p234_p13 = scmp.lt.s32.totalorder %s644_s21, 1  ;;  %v592_v0 = vmov 0   ;;  %s231_s25 = sand.u32 1, %s580_s18   ;;  %v264_v5 = vld [vmem:[#allocation4] sm:$0xff] }
  0x1a   : > { %454 = vset.pattern.permute.xlu0 %v592_v0  ;;  %s386_s7 = sshll.u32 %s231_s25, 3  ;;  %s390_s8 = sshll.u32 %s644_s21, 3  ;;  %v455_v7 = vld [vmem:[#allocation7] ss:$0 sm:$0xff]  ;;  %v456_v8 = vld [vmem:[#allocation7 + $0x1] ss:$0 sm:$0xff] }
  0x1b   : > { %s235_s15 = scalar_select %p234_p13, %s644_s21, 1  ;;  %v457_v9 = vld [vmem:[#allocation7 + $0x2] ss:$0 sm:$0xff]  ;;  %vm267_vm4 = vcmask 261120  }
  0x1c   : > { %s280_s11 = scalar_lea.hbm %s741_s5, %s390_s8  ;;  %s233_s12 = scalar_lea.vmem [#allocation9], %s386_s7 }
  0x1d   : > { %s387_s16 = sshll.u32 %s235_s15, 3  ;;  %s282_s13 = sshll.u32 %s233_s12, 4  ;;  %s283_s13 = int_to_ptr.vmem [resolvable:$true] %s282_s13 }
  0x1e   : > { %s241_s24 = scalar_lea.vmem %s739_s3, %s387_s16  ;;  %s237_s6 = scalar_lea.vmem %s737_s1, %s387_s16 }
  0x1f   : > { %v243_v1 = vld [vmem:[%s241_s24] sm:$0xff]  ;;  %s284_s14 = sshll.u32 %s280_s11, 4  ;;  %s270_s21 = scalar_lea.sflag [#allocation6], %s231_s25  ;;  %s285_s14 = int_to_ptr.hbm [resolvable:$true] %s284_s14 }
  0x20   : > { %vm246_vm0 = vcmp.eq.s32.totalorder %v243_v1, 1  ;;  %vm255_vm1 = vcmp.eq.s32.totalorder %v243_v1, 2  ;;  %v242_v6 = vld [vmem:[%s237_s6] sm:$0xff]  ;;  %s532_s15 = sshra.s32 %s285_s14, 4  ;;  %s538_s24 = scalar_lea.hbm %s741_s5, 16  ;;  %s533_s15 = int_to_ptr.hbm [resolvable:$true] %s532_s15 }
  0x21   : > { %v248_v2 = vsel %vm246_vm0, 1, %v592_v0  ;;  %v257_v3 = vsel %vm255_vm1, 1, %v592_v0  ;;  %v265_v10 = vadd.f32 %v264_v5, %v242_v6  ;;  %s534_s16 = scalar_lea.hbm %s533_s15, 8  ;;  %p539_p3 = scmp.lt.s32.totalorder %s533_s15, %s741_s5 }
  0x22   : > { %250 = vperm.xlu0 %454, %v248_v2   ;;  %p535_p0 = scmp.ne.s32.totalorder %s533_s15, %s534_s16  ;;  %p540_p4 = scmp.lt.s32.totalorder %s538_s24, %s534_s16 }
  0x24   : > { %p536_p1 = pnand %p535_p0, %p661_p5  ;;  %p541_p7 = por %p540_p4, %p539_p3 }
  0x26   : > { %p537_p2 = pneg %p536_p1 }
  0x28   : > { %p542_p8 = pnand %p541_p7, %p537_p2 }
  0x2a   : > { %259 = vperm.xlu0 %454, %v257_v3  }
  0x94   : > { %v251_v4 = vpop.permute.xlu0 %250 }
  0x95   : > { %vm252_vm2 = vcmp.eq.s32.totalorder %v251_v4, 1 }
  0x96   : > { %v254_v12 = vsel %vm252_vm2, %v456_v8, %v455_v7 }
  0x9c   : > { %v260_v11 = vpop.permute.xlu0 %259 }
  0x9d   : > { %vm261_vm3 = vcmp.eq.s32.totalorder %v260_v11, 1 }
  0x9e   : > { %v263_v13 = vsel %vm261_vm3, %v457_v9, %v254_v12 }
  0x9f   : > { %v266_v14 = vadd.f32 %v265_v10, %v263_v13 }
  0xa1   : > { %268 = vst.msk [vmem:[%s233_s12] sm:$0xff] %vm267_vm4, %v266_v14 }
  0xa2   : > { %545 = shalt.err (!%p542_p8)
}
  0xa3   : > { %401 = dma.vmem_to_hbm [thread:$0]  (%p661_p5), %s283_s13, 128, %s285_s14, %s270_s21  }
  0xa4 PF: > { %p418_p9 = scmp.ge.s32.totalorder %s588_s20, 2  ;;  %s296_s25 = sand.u32 1, %s576_s0  }
  0xa5   : > { %s297_s6 = scalar_lea.sflag [#allocation6], %s296_s25 }
  0xa6   : > { %p411_p10 = pnand %p418_p9, %p665_p6 }
  0xa8   : > { %p412_p11 = pneg %p411_p10 }
  0xaa   : > { %571 = dma.done.wait (%p412_p11), %s297_s6, 128  }
  0xab   : > { %573 = vsyncadd (%p412_p11), %s297_s6, 4294967168  ;;  %p18_p12 = scmp.ge.s32.totalorder %s648_s23, 4   ;;  %s745_s0 = smov %s580_s18 }
  0xac   : > { %s746_s18 = smov %s584_s19  ;;  %s747_s19 = smov %s659_s26 }
  0xad   : > { %s748_s20 = smov %s648_s23  ;;  %20 = sbr.rel (!%p18_p12) target bundleno = 5 (0x5), region = 83 }
  0xb2   :  { %303 = vsyncpa [#allocation5], 1 }
  0xb3   :  { %305 = vsyncpa [#allocation5 + $0x1], 1 }
  0xb4   :  { %306 = vsyncpa [#allocation8], 1 }
  0xb5   :  { %307 = vsyncpa [#allocation6], 1 }
  0xb6   :  { %309 = vsyncpa [#allocation6 + $0x1], 1 }

</bundles_post_ra>
